<compile_context>
chip_gen: v7x
topology: tpu7x:2x2x1
jax: 0.10.0
libtpu: 0.0.40
codegen_flags: <defaults>
</compile_context>

<pallas_src>
import jax
import jax.numpy as jnp
from jax.experimental import pallas as pl
from jax.experimental.pallas import tpu as pltpu


def _round_up(x, m):
    return ((x + m - 1) // m) * m


def _vmem_limit_bytes():
    # Leave ~20% headroom for Mosaic internal scratch / semaphores; requesting
    # the full physical VMEM (esp. v7x's 64 MiB per TC) risks compile failure
    # or forced spills.
    try:
        cap = pltpu.get_tpu_info().vmem_capacity_bytes
    except Exception:  # conservative fallback if the query is unavailable
        cap = 64 * 1024 * 1024
    return int(cap * 0.80)


def prepare_ffn_params(weight, bias):
    """One-time transform of PyTorch-layout params for the kernel.

    weight: (out, in) f32 -> (in, out_pad) bf16   (transposed, N padded to x128)
    bias:   (out,)    f32 -> (1,  out_pad) f32
    Hoisted out of the per-call path so the transpose/pad/cast HBM passes are
    paid once, not on every forward call.
    """
    e_out, _ = weight.shape
    e_out_pad = _round_up(e_out, 128)
    w_t = weight.T.astype(jnp.bfloat16)            # (in, out), bf16 for the MXU
    b = bias.astype(jnp.float32)
    if e_out_pad != e_out:
        w_t = jnp.pad(w_t, ((0, 0), (0, e_out_pad - e_out)))
        b = jnp.pad(b, (0, e_out_pad - e_out))
    return w_t, b.reshape(1, e_out_pad)


def _ffn_kernel(x_ref, w_ref, b_ref, o_ref):
    # x_ref: (tm, E) f32 -- cast to bf16 in-register so the MXU runs its bf16
    # path (f32 accumulation via preferred_element_type).
    # w_ref: (E, tn) bf16; b_ref: (1, tn) f32; o_ref: (tm, tn) f32.
    x_bf16 = x_ref[...].astype(jnp.bfloat16)
    y = jnp.dot(x_bf16, w_ref[...], preferred_element_type=jnp.float32)
    y = y + b_ref[...]                        # bias broadcast over rows, in f32
    o_ref[...] = jnp.maximum(y, 0.0).astype(o_ref.dtype)


def feed_forward(x, w_t, b2d, *, tm=512, tn=512):
    """relu(x @ W.T + b) with prepared params (see prepare_ffn_params).

    x:   (B, S, E) float32
    w_t: (E, E_out_pad) bfloat16  (pre-transposed / N-padded weight)
    b2d: (1, E_out_pad) float32
    """
    B, S, E = x.shape
    M = B * S
    e_in, e_out_pad = w_t.shape
    assert e_in == E, "weight input dim must match x feature dim"

    # Tile sizes: tm is a multiple of 8 (sublane), tn a multiple of 128 (lane)
    # and of 256 at the default (full 256-wide MXU on v6e/v7x).  Clamp for
    # tiny inputs so we don't read far past the array.
    tm = min(tm, _round_up(M, 8))
    tn = min(tn, e_out_pad)

    # No activation padding / no M-slice: ragged last M tile is handled by
    # Pallas (reads past M are unspecified but their output rows are dropped).
    x2d = x.reshape(M, E)

    grid = (pl.cdiv(M, tm), pl.cdiv(e_out_pad, tn))

    cost = pl.CostEstimate(
        flops=2 * M * E * e_out_pad,
        bytes_accessed=(4 * M * E             # x (f32), read once (resident over N)
                        + 2 * E * e_out_pad   # weight (bf16)
                        + 4 * e_out_pad       # bias (f32)
                        + 4 * M * e_out_pad), # output (f32)
        transcendentals=0,
    )

    # TODO(synk): for very large E (tm*E*4 bytes of x approaching the VMEM
    # budget), add a K grid axis + f32 accumulator scratch so x/weight stream
    # in (tm, TK) / (TK, tn) slabs as well.
    out2d = pl.pallas_call(
        _ffn_kernel,
        out_shape=jax.ShapeDtypeStruct((M, e_out_pad), x.dtype),
        grid_spec=pltpu.PrefetchScalarGridSpec(
            num_scalar_prefetch=0,
            grid=grid,
            in_specs=[
                # x tile: index_map constant over the inner N axis -> stays
                # resident in VMEM while the weight slabs stream past it.
                pl.BlockSpec((tm, E), lambda i, j: (i, 0)),
                # weight slab, streamed over N (double-buffered by Pallas).
                pl.BlockSpec((E, tn), lambda i, j: (0, j)),
                # bias slab, streamed over N.
                pl.BlockSpec((1, tn), lambda i, j: (0, j)),
            ],
            out_specs=pl.BlockSpec((tm, tn), lambda i, j: (i, j)),
        ),
        compiler_params=pltpu.CompilerParams(
            # No reduction axis -> both grid axes are independent.
            # TODO(synk): on v7x, CORE_PARALLEL (or pl.core_map over a
            # tensorcore mesh) is needed to shard the M axis across both TCs.
            dimension_semantics=("parallel", "parallel"),
            vmem_limit_bytes=_vmem_limit_bytes(),
        ),
        cost_estimate=cost,
    )(x2d, w_t, b2d)

    if e_out_pad != E:                        # drop lane-padding columns only
        out2d = out2d[:, :E]
    return out2d.reshape(B, S, E)


if __name__ == "__main__":
    key = jax.random.PRNGKey(0)
    k_x, k_w, k_b = jax.random.split(key, 3)

    batch, seq, embedding_dim = 2, 8, 32

    # Deterministic parameter init (mimics nn.Linear uniform(-1/sqrt(in), 1/sqrt(in)))
    bound = 1.0 / (embedding_dim ** 0.5)
    weight = jax.random.uniform(
        k_w, (embedding_dim, embedding_dim), jnp.float32, -bound, bound
    )
    bias = jax.random.uniform(k_b, (embedding_dim,), jnp.float32, -bound, bound)

    x = jax.random.normal(k_x, (batch, seq, embedding_dim), jnp.float32)

    # One-time parameter transform (hoisted out of the per-call path).
    w_t, b2d = prepare_ffn_params(weight, bias)

    out = feed_forward(x, w_t, b2d)
    out = jax.block_until_ready(out)

    # Reference in plain JAX (same semantics as PyTorch Linear + ReLU).
    ref = jnp.maximum(jnp.einsum("bse,oe->bso", x, weight) + bias, 0.0)
    assert out.shape == (batch, seq, embedding_dim)
    # Tolerance loosened vs pure-f32: MXU inputs are bf16 (accumulation is f32).
    assert jnp.allclose(out, ref, atol=3e-2, rtol=3e-2), "mismatch vs reference"

    print("KERNEL_OK")
</pallas_src>

<mosaic_0001>
module attributes {stable_mosaic.version = 11 : i64} {
  func.func @_ffn_kernel(%arg0: i32, %arg1: i32, %arg2: memref<16x32xf32, #tpu.memory_space<vmem>>, %arg3: memref<32x128xbf16, #tpu.memory_space<vmem>>, %arg4: memref<1x128xf32, #tpu.memory_space<vmem>>, %arg5: memref<16x128xf32, #tpu.memory_space<vmem>>) attributes {dimension_semantics = [#tpu.dimension_semantics<parallel>, #tpu.dimension_semantics<parallel>], iteration_bounds = array<i64: 1, 1>, scalar_prefetch = 0 : i64, scratch_operands = 0 : i64, tpu.core_type = #tpu.core_type<tc>, window_params = [{transform_indices = @transform_0, window_bounds = array<i64: 16, 32>}, {transform_indices = @transform_1, window_bounds = array<i64: 32, 128>}, {transform_indices = @transform_2, window_bounds = array<i64: 1, 128>}, {transform_indices = @transform_3, window_bounds = array<i64: 16, 128>}]} {
    %c0 = arith.constant 0 : index
    %c0_0 = arith.constant 0 : index
    %0 = vector.load %arg2[%c0, %c0_0] : memref<16x32xf32, #tpu.memory_space<vmem>>, vector<16x32xf32>
    %1 = arith.truncf %0 : vector<16x32xf32> to vector<16x32xbf16>
    %c0_1 = arith.constant 0 : index
    %c0_2 = arith.constant 0 : index
    %2 = vector.load %arg3[%c0_1, %c0_2] : memref<32x128xbf16, #tpu.memory_space<vmem>>, vector<32x128xbf16>
    %cst = arith.constant dense<0.000000e+00> : vector<16x128xf32>
    %3 = tpu.matmul %1, %2, %cst {dimension_numbers = #tpu.dot_dimension_numbers<[1], [0], [0], [1], [0, 0, 1, 1], [], []>} : vector<16x32xbf16>, vector<32x128xbf16>, vector<16x128xf32> -> vector<16x128xf32>
    %c0_3 = arith.constant 0 : index
    %c0_4 = arith.constant 0 : index
    %4 = vector.load %arg4[%c0_3, %c0_4] : memref<1x128xf32, #tpu.memory_space<vmem>>, vector<1x128xf32>
    %5 = vector.broadcast %4 : vector<1x128xf32> to vector<16x128xf32>
    %6 = arith.addf %3, %5 : vector<16x128xf32>
    %cst_5 = arith.constant 0.000000e+00 : f32
    %7 = vector.broadcast %cst_5 : f32 to vector<16x128xf32>
    %8 = arith.maximumf %6, %7 : vector<16x128xf32>
    %c0_6 = arith.constant 0 : index
    %c0_7 = arith.constant 0 : index
    %9 = vector.load %arg5[%c0_6, %c0_7] : memref<16x128xf32, #tpu.memory_space<vmem>>, vector<16x128xf32>
    tpu.vector_store %arg5[%c0_6, %c0_7], %8 {strides = array<i32>} : memref<16x128xf32, #tpu.memory_space<vmem>>, vector<16x128xf32>,
    return
  }
  func.func @transform_0(%arg0: i32, %arg1: i32) -> (i32, i32) {
    %c0_i32 = arith.constant 0 : i32
    %c0_i32_0 = arith.constant 0 : i32
    return %arg0, %c0_i32 : i32, i32
  }
  func.func @transform_1(%arg0: i32, %arg1: i32) -> (i32, i32) {
    %c0_i32 = arith.constant 0 : i32
    %c0_i32_0 = arith.constant 0 : i32
    return %c0_i32, %arg1 : i32, i32
  }
  func.func @transform_2(%arg0: i32, %arg1: i32) -> (i32, i32) {
    %c0_i32 = arith.constant 0 : i32
    %c0_i32_0 = arith.constant 0 : i32
    return %c0_i32, %arg1 : i32, i32
  }
  func.func @transform_3(%arg0: i32, %arg1: i32) -> (i32, i32) {
    %c0_i32 = arith.constant 0 : i32
    return %arg0, %arg1 : i32, i32
  }
}

</mosaic_0001>

<bundles_post_ra>
// kernel: tpu_custom_call.1
= control target key start
LH: loop header
LB: loop body
LE: loop exit
PB: predicated region body
PF: predicated region fallthrough
CT: control target
= control target key end

     0   :  { %8 = vsyncpa [#allocation3], 0  ;;  %s309_s0 = inlined_call_operand.hbm [shape: f32[16,32], index: 0, kind: input, shape index: {}]   ;;  %s310_s1 = inlined_call_operand.hbm [shape: bf16[32,128], index: 1, kind: input, shape index: {}]   ;;  %s311_s2 = inlined_call_operand.vmem [shape: f32[1,128], index: 2, kind: input, shape index: {}]   ;;  %s312_s3 = inlined_call_operand.hbm [shape: f32[16,128], index: 3, kind: output, shape index: {}]  }
   0x1   :  { %9 = vsyncpa [#allocation6], 0 }
   0x2   :  { %10 = vsyncpa [#allocation4], 0  ;;  %s235_s12 = smov [#allocation2]   ;;  %s163_s16 = scalar_lea.hbm %s309_s0, 256 }
   0x3   :  { %s16_s13 = sshll.u32 %s235_s12, 4  ;;  %p164_p0 = scmp.ne.s32.totalorder %s309_s0, %s163_s16  ;;  %s17_s13 = int_to_ptr.vmem [resolvable:$true] %s16_s13 }
   0x4   :  { %p167_p1 = scmp.lt.u32.totalorder %s163_s16, %s309_s0 }
   0x6   :  { %p169_p2 = pnand %p167_p1, %p164_p0 }
   0x8   :  { %172 = shalt.err (!%p169_p2)
}
   0x9   :  { %s173_s21 = scalar_lea.vmem %s17_s13, 256  ;;  %p178_p4 = scmp.lt.s32.totalorder %s17_s13, %s17_s13 }
   0xa   :  { %p174_p3 = scmp.ne.s32.totalorder %s17_s13, %s173_s21  ;;  %p179_p5 = scmp.lt.s32.totalorder %s173_s21, %s173_s21 }
   0xc   :  { %p180_p6 = por %p179_p5, %p178_p4 }
   0xe   :  { %p181_p7 = pnand %p180_p6, %p174_p3 }
  0x10   :  { %184 = shalt.err (!%p181_p7)
}
  0x11   :  { %s236_s22 = smov 128   ;;  %s237_s23 = smov 8  }
  0x12   :  { %22 = dma.hbm_to_vmem [thread:$0]  %s309_s0, 256, %s17_s13, [#allocation3], %s236_s22, %s236_s22, %s237_s23  }
  0x13   :  { %s238_s26 = smov [#allocation5]   ;;  %s185_s30 = scalar_lea.hbm %s310_s1, 256 }
  0x14   :  { %s28_s27 = sshll.u32 %s238_s26, 4  ;;  %p186_p8 = scmp.ne.s32.totalorder %s310_s1, %s185_s30  ;;  %s29_s27 = int_to_ptr.vmem [resolvable:$true] %s28_s27 }
  0x15   :  { %p189_p9 = scmp.lt.u32.totalorder %s185_s30, %s310_s1 }
  0x17   :  { %p191_p10 = pnand %p189_p9, %p186_p8 }
  0x19   :  { %194 = shalt.err (!%p191_p10)
}
  0x1a   :  { %s195_s8 = scalar_lea.vmem %s29_s27, 256  ;;  %p200_p12 = scmp.lt.s32.totalorder %s29_s27, %s29_s27 }
  0x1b   :  { %p196_p11 = scmp.ne.s32.totalorder %s29_s27, %s195_s8  ;;  %p201_p13 = scmp.lt.s32.totalorder %s195_s8, %s195_s8 }
  0x1d   :  { %p202_p0 = por %p201_p13, %p200_p12 }
  0x1f   :  { %p203_p1 = pnand %p202_p0, %p196_p11 }
  0x21   :  { %206 = shalt.err (!%p203_p1)
}
  0x22   :  { %s239_s0 = smov 64   ;;  %s240_s9 = smov 4  }
  0x23   :  { %34 = dma.hbm_to_vmem [thread:$0]  %s310_s1, 256, %s29_s27, [#allocation6], %s239_s0, %s239_s0, %s240_s9  }
  0x24   :  { %229 = dma.done.wait [#allocation3], 256  }
  0x25   :  { %230 = vsyncadd [#allocation3], 4294967040 }
  0x26   :  { %231 = dma.done.wait [#allocation6], 256  }
  0x27   :  { %232 = vsyncadd [#allocation6], 4294967040  ;;  %v241_v0 = vmov 0.0   ;;  %vm242_vm0 = vmmov 0   ;;  %v161_v1 = vld [vmem:[#allocation5] sm:$0xff]   ;;  %v162_v2 = vld [vmem:[#allocation5 + $0x8] sm:$0xff]  }
  0x28   :  { %144 = vmatprep.subr.bf16.mxu0 %v241_v0  ;;  %148 = vmatprep.mubr.msk.bf16.mxu0 %vm242_vm0, %v241_v0  ;;  %v44_v3 = vld [vmem:[#allocation2] sm:$0xff]  ;;  %v45_v4 = vld [vmem:[#allocation2 + $0x8] sm:$0xff]  ;;  %vm70_vm1 = vcmask 261120   ;;  %s243_s13 = smov [#allocation7]  }
  0x29   :  { %145 = vmatpush3.bf16.msra.mxu0 %v161_v1  ;;  %v46_v5 = vpack.c.bf16 %v45_v4, %v44_v3  ;;  %v137_v6 = vld [vmem:[%s311_s2] ss:$0 sm:$0xff]  ;;  %s124_s14 = sshll.u32 %s243_s13, 4  ;;  %s125_s14 = int_to_ptr.vmem [resolvable:$true] %s124_s14 }
  0x2a   :  { %146 = vmatprep.subr.bf16.mxu0 %v241_v0  ;;  %s207_s15 = scalar_lea.vmem %s125_s14, 256  ;;  %p212_p3 = scmp.lt.s32.totalorder %s125_s14, %s125_s14 }
  0x2b   :  { %p208_p2 = scmp.ne.s32.totalorder %s125_s14, %s207_s15  ;;  %p213_p4 = scmp.lt.s32.totalorder %s207_s15, %s207_s15 }
  0x2d   :  { %147 = vmatpush3.bf16.msra.mxu0 %v162_v2  ;;  %p214_p5 = por %p213_p4, %p212_p3 }
  0x2f   :  { %p215_p6 = pnand %p214_p5, %p208_p2 }
  0x30   :  { %149 = vmatmul.mubr.msk.bf16.vlgmr.msra.gmra.mrb[0].mxu0 %vm70_vm1, %v46_v5 }
 0x103   :  { %v108_v7 = vpop.f32.mrb[0].mxu0 }
 0x104   :  { %v109_v8 = vadd.f32 %v137_v6, %v108_v7  ;;  %v150_v9 = vpop.f32.mrb[1].mxu0 }
 0x105   :  { %v111_v10 = vpop.f32.mrb[2].mxu0 }
 0x106   :  { %v115_v11 = vmax.f32 %v109_v8, 0.0  ;;  %v112_v12 = vadd.f32 %v137_v6, %v111_v10  ;;  %v151_v13 = vpop.f32.mrb[3].mxu0 }
 0x108   :  { %117 = vst [vmem:[#allocation7] sm:$0xff] %v115_v11  ;;  %v116_v14 = vmax.f32 %v112_v12, 0.0 }
 0x10a   :  { %118 = vst [vmem:[#allocation7 + $0x8] sm:$0xff] %v116_v14 }
 0x10b   :  { %218 = shalt.err (!%p215_p6)
}
 0x10c   :  { %s219_s17 = scalar_lea.hbm %s312_s3, 256 }
 0x10d   :  { %p220_p7 = scmp.ne.s32.totalorder %s312_s3, %s219_s17  ;;  %p223_p8 = scmp.lt.u32.totalorder %s219_s17, %s312_s3 }
 0x10f   :  { %p225_p9 = pnand %p223_p8, %p220_p7 }
 0x111   :  { %228 = shalt.err (!%p225_p9)
}
 0x112   :  { %130 = dma.vmem_to_hbm [thread:$0]  %s125_s14, 256, %s312_s3, [#allocation4], %s236_s22, %s236_s22, %s237_s23  }
 0x113   :  { %233 = dma.done.wait [#allocation4], 256  }
 0x114   :  { %234 = vsyncadd [#allocation4], 4294967040 }
 0x115   :  { %134 = vsyncpa [#allocation3], 1 }
 0x116   :  { %135 = vsyncpa [#allocation6], 1 }
 0x117   :  { %136 = vsyncpa [#allocation4], 1 }

</bundles_post_ra>
